<compile_context>
chip_gen: v6e
topology: v6e:2x2x1
jax: 0.10.0
libtpu: 0.0.40
codegen_flags: <defaults>
</compile_context>

<pallas_src>
import functools

import jax
import jax.numpy as jnp
from jax.experimental import pallas as pl
from jax.experimental.pallas import tpu as pltpu

_NSEM = 8  # ring of in-flight row DMAs (power of two)


def _round_up(x, m):
    return ((x + m - 1) // m) * m


def _gather_kernel(ids_ref, w_hbm, out_ref, sem):
    # ids_ref: SMEM [n_pad]       int32 token ids (scalar prefetch, whole array)
    # w_hbm:   HBM  [vocab, dim]  embedding table (memory_space=pl.ANY, no auto-DMA)
    # out_ref: VMEM [t_blk, dim]  output block for this grid step
    # sem:     DMA semaphore ring [_NSEM]
    t_blk = out_ref.shape[0]
    base = pl.program_id(0) * t_blk

    def issue(tok, slot):
        row = ids_ref[base + tok]
        pltpu.make_async_copy(w_hbm.at[row], out_ref.at[tok], sem.at[slot]).start()

    # Prime the ring: up to _NSEM row copies in flight.
    n_prime = min(_NSEM, t_blk)
    for t in range(n_prime):          # static, tiny
        issue(t, t)

    @pl.loop(0, t_blk)
    def _(t):
        slot = t & (_NSEM - 1)
        # Wait for row copy `t`; every copy on this slot has the same byte
        # count, so per-descriptor waits in issue order are exact.
        pltpu.make_async_copy(w_hbm.at[0], out_ref.at[0], sem.at[slot]).wait()
        nxt = t + _NSEM

        @pl.when(nxt < t_blk)
        def _():
            issue(nxt, slot)


@functools.partial(jax.jit, static_argnames=("t_blk",))
def word_embedding(inputs, weight, *, t_blk=256):
    """Embedding lookup: out[b, s, :] = weight[inputs[b, s], :].

    Args:
      inputs: [bz, seq] integer token ids.
      weight: [vocab_size, embedding_dim] embedding table.
    Returns:
      [bz, seq, embedding_dim] embeddings (same dtype as `weight`).
    """
    bz, seq = inputs.shape
    vocab, dim = weight.shape
    n_tok = bz * seq

    w = jnp.asarray(weight)
    itemsize = jnp.dtype(w.dtype).itemsize

    # Token-block size: multiple of 8, large enough to amortize per-step
    # pipeline overhead, small enough that the double-buffered [t_blk, dim]
    # output block stays well inside v5e's 16 MiB default scoped VMEM (and
    # trivially inside v6e/v7x budgets).
    vmem_cap = 8 * 1024 * 1024
    max_tblk = max(8, (vmem_cap // (2 * dim * itemsize)) // 8 * 8)
    t_blk = min(t_blk, max_tblk, _round_up(n_tok, 8))
    n_pad = _round_up(n_tok, t_blk)
    n_tblk = n_pad // t_blk

    ids = jnp.reshape(inputs, (n_tok,)).astype(jnp.int32)
    # PyTorch nn.Embedding raises on out-of-range ids; here we clamp so the
    # per-row DMA stays in bounds (invalid ids are caller error either way).
    ids = jnp.clip(ids, 0, vocab - 1)
    if n_pad != n_tok:
        # Padded tail tokens gather row 0 (a few extra row DMAs), sliced off below.
        ids = jnp.pad(ids, (0, n_pad - n_tok))

    cost = pl.CostEstimate(
        flops=0,
        transcendentals=0,
        # ids read + gathered rows read from HBM + output rows written to HBM.
        bytes_accessed=n_pad * 4 + 2 * n_pad * dim * itemsize,
    )

    out = pl.pallas_call(
        _gather_kernel,
        out_shape=jax.ShapeDtypeStruct((n_pad, dim), w.dtype),
        grid_spec=pltpu.PrefetchScalarGridSpec(
            num_scalar_prefetch=1,                           # ids -> SMEM
            grid=(n_tblk,),
            in_specs=[pl.BlockSpec(memory_space=pl.ANY)],    # table stays in HBM
            out_specs=pl.BlockSpec((t_blk, dim), lambda i, ids: (i, 0)),
            scratch_shapes=[pltpu.SemaphoreType.DMA((_NSEM,))],
        ),
        compiler_params=pltpu.CompilerParams(
            dimension_semantics=("parallel",)),
        cost_estimate=cost,
    )(ids, w)

    return out[:n_tok].reshape(bz, seq, dim)


def _reference(inputs, weight):
    return jnp.take(weight, inputs, axis=0)


if __name__ == "__main__":
    vocab_size, embedding_dim = 100, 32
    bz, seq_len = 2, 8
    padding_idx = 0

    key = jax.random.PRNGKey(0)
    k_w, k_ids = jax.random.split(key)

    # Embedding table; nn.Embedding(padding_idx=0) zeroes that row at init.
    weight = jax.random.normal(k_w, (vocab_size, embedding_dim), dtype=jnp.float32)
    weight = weight.at[padding_idx].set(0.0)

    inputs = jax.random.randint(k_ids, (bz, seq_len), 0, vocab_size, dtype=jnp.int32)
    inputs = inputs.at[:, -2:].set(padding_idx)   # include some padding tokens

    out = word_embedding(inputs, weight)
    out = jax.block_until_ready(out)

    ref = _reference(inputs, weight)
    assert out.shape == (bz, seq_len, embedding_dim)
    assert jnp.allclose(out, ref, atol=1e-6, rtol=1e-6)

    # TODO(synk): freeze_embeddings / sparse / padding_idx gradient masking are
    # training-time (backward) behaviors and do not affect this forward lookup.
    print("KERNEL_OK")
</pallas_src>

<mosaic_0001>
module attributes {stable_mosaic.version = 11 : i64} {
  func.func @_gather_kernel(%arg0: i32, %arg1: memref<16xi32, #tpu.memory_space<smem>>, %arg2: memref<100x32xf32, #tpu.memory_space<any>>, %arg3: memref<16x32xf32, #tpu.memory_space<vmem>>, %arg4: memref<8x!tpu.dma_semaphore, #tpu.memory_space<semaphore_mem>>) attributes {dimension_semantics = [#tpu.dimension_semantics<parallel>], iteration_bounds = array<i64: 1>, scalar_prefetch = 1 : i64, scratch_operands = 1 : i64, tpu.core_type = #tpu.core_type<tc>, window_params = [{}, {transform_indices = @transform_1, window_bounds = array<i64: 16, 32>}]} {
    %c16_i32 = arith.constant 16 : i32
    %0 = arith.muli %arg0, %c16_i32 : i32
    %c0_i32 = arith.constant 0 : i32
    %1 = arith.addi %0, %c0_i32 : i32
    %2 = arith.index_cast %1 : i32 to index
    %3 = memref.load %arg1[%2] : memref<16xi32, #tpu.memory_space<smem>>
    %c0_i32_0 = arith.constant 0 : i32
    %c0_i32_1 = arith.constant 0 : i32
    %c0_i32_2 = arith.constant 0 : i32
    %4 = tpu.memref_slice %arg2[%3, %c0_i32_2] : memref<100x32xf32, #tpu.memory_space<any>> -> memref<1x32xf32, #tpu.memory_space<any>>
    %5 = tpu.memref_squeeze %4 : memref<1x32xf32, #tpu.memory_space<any>> -> memref<32xf32, #tpu.memory_space<any>>
    %c0_i32_3 = arith.constant 0 : i32
    %6 = tpu.memref_slice %arg3[%c0_i32_0, %c0_i32_3] : memref<16x32xf32, #tpu.memory_space<vmem>> -> memref<1x32xf32, #tpu.memory_space<vmem>>
    %7 = tpu.memref_squeeze %6 : memref<1x32xf32, #tpu.memory_space<vmem>> -> memref<32xf32, #tpu.memory_space<vmem>>
    %8 = tpu.memref_slice %arg4[%c0_i32_1] : memref<8x!tpu.dma_semaphore, #tpu.memory_space<semaphore_mem>> -> memref<1x!tpu.dma_semaphore, #tpu.memory_space<semaphore_mem>>
    %9 = tpu.memref_squeeze %8 : memref<1x!tpu.dma_semaphore, #tpu.memory_space<semaphore_mem>> -> memref<!tpu.dma_semaphore, #tpu.memory_space<semaphore_mem>>
    tpu.enqueue_dma source(%5 : memref<32xf32, #tpu.memory_space<any>>) target(%7 : memref<32xf32, #tpu.memory_space<vmem>>) target_semaphore(%9 : memref<!tpu.dma_semaphore, #tpu.memory_space<semaphore_mem>>)
    %c1_i32 = arith.constant 1 : i32
    %10 = arith.addi %0, %c1_i32 : i32
    %11 = arith.index_cast %10 : i32 to index
    %12 = memref.load %arg1[%11] : memref<16xi32, #tpu.memory_space<smem>>
    %c1_i32_4 = arith.constant 1 : i32
    %c1_i32_5 = arith.constant 1 : i32
    %c0_i32_6 = arith.constant 0 : i32
    %13 = tpu.memref_slice %arg2[%12, %c0_i32_6] : memref<100x32xf32, #tpu.memory_space<any>> -> memref<1x32xf32, #tpu.memory_space<any>>
    %14 = tpu.memref_squeeze %13 : memref<1x32xf32, #tpu.memory_space<any>> -> memref<32xf32, #tpu.memory_space<any>>
    %c0_i32_7 = arith.constant 0 : i32
    %15 = tpu.memref_slice %arg3[%c1_i32_4, %c0_i32_7] : memref<16x32xf32, #tpu.memory_space<vmem>> -> memref<1x32xf32, #tpu.memory_space<vmem>>
    %16 = tpu.memref_squeeze %15 : memref<1x32xf32, #tpu.memory_space<vmem>> -> memref<32xf32, #tpu.memory_space<vmem>>
    %17 = tpu.memref_slice %arg4[%c1_i32_5] : memref<8x!tpu.dma_semaphore, #tpu.memory_space<semaphore_mem>> -> memref<1x!tpu.dma_semaphore, #tpu.memory_space<semaphore_mem>>
    %18 = tpu.memref_squeeze %17 : memref<1x!tpu.dma_semaphore, #tpu.memory_space<semaphore_mem>> -> memref<!tpu.dma_semaphore, #tpu.memory_space<semaphore_mem>>
    tpu.enqueue_dma source(%14 : memref<32xf32, #tpu.memory_space<any>>) target(%16 : memref<32xf32, #tpu.memory_space<vmem>>) target_semaphore(%18 : memref<!tpu.dma_semaphore, #tpu.memory_space<semaphore_mem>>)
    %c2_i32 = arith.constant 2 : i32
    %19 = arith.addi %0, %c2_i32 : i32
    %20 = arith.index_cast %19 : i32 to index
    %21 = memref.load %arg1[%20] : memref<16xi32, #tpu.memory_space<smem>>
    %c2_i32_8 = arith.constant 2 : i32
    %c2_i32_9 = arith.constant 2 : i32
    %c0_i32_10 = arith.constant 0 : i32
    %22 = tpu.memref_slice %arg2[%21, %c0_i32_10] : memref<100x32xf32, #tpu.memory_space<any>> -> memref<1x32xf32, #tpu.memory_space<any>>
    %23 = tpu.memref_squeeze %22 : memref<1x32xf32, #tpu.memory_space<any>> -> memref<32xf32, #tpu.memory_space<any>>
    %c0_i32_11 = arith.constant 0 : i32
    %24 = tpu.memref_slice %arg3[%c2_i32_8, %c0_i32_11] : memref<16x32xf32, #tpu.memory_space<vmem>> -> memref<1x32xf32, #tpu.memory_space<vmem>>
    %25 = tpu.memref_squeeze %24 : memref<1x32xf32, #tpu.memory_space<vmem>> -> memref<32xf32, #tpu.memory_space<vmem>>
    %26 = tpu.memref_slice %arg4[%c2_i32_9] : memref<8x!tpu.dma_semaphore, #tpu.memory_space<semaphore_mem>> -> memref<1x!tpu.dma_semaphore, #tpu.memory_space<semaphore_mem>>
    %27 = tpu.memref_squeeze %26 : memref<1x!tpu.dma_semaphore, #tpu.memory_space<semaphore_mem>> -> memref<!tpu.dma_semaphore, #tpu.memory_space<semaphore_mem>>
    tpu.enqueue_dma source(%23 : memref<32xf32, #tpu.memory_space<any>>) target(%25 : memref<32xf32, #tpu.memory_space<vmem>>) target_semaphore(%27 : memref<!tpu.dma_semaphore, #tpu.memory_space<semaphore_mem>>)
    %c3_i32 = arith.constant 3 : i32
    %28 = arith.addi %0, %c3_i32 : i32
    %29 = arith.index_cast %28 : i32 to index
    %30 = memref.load %arg1[%29] : memref<16xi32, #tpu.memory_space<smem>>
    %c3_i32_12 = arith.constant 3 : i32
    %c3_i32_13 = arith.constant 3 : i32
    %c0_i32_14 = arith.constant 0 : i32
    %31 = tpu.memref_slice %arg2[%30, %c0_i32_14] : memref<100x32xf32, #tpu.memory_space<any>> -> memref<1x32xf32, #tpu.memory_space<any>>
    %32 = tpu.memref_squeeze %31 : memref<1x32xf32, #tpu.memory_space<any>> -> memref<32xf32, #tpu.memory_space<any>>
    %c0_i32_15 = arith.constant 0 : i32
    %33 = tpu.memref_slice %arg3[%c3_i32_12, %c0_i32_15] : memref<16x32xf32, #tpu.memory_space<vmem>> -> memref<1x32xf32, #tpu.memory_space<vmem>>
    %34 = tpu.memref_squeeze %33 : memref<1x32xf32, #tpu.memory_space<vmem>> -> memref<32xf32, #tpu.memory_space<vmem>>
    %35 = tpu.memref_slice %arg4[%c3_i32_13] : memref<8x!tpu.dma_semaphore, #tpu.memory_space<semaphore_mem>> -> memref<1x!tpu.dma_semaphore, #tpu.memory_space<semaphore_mem>>
    %36 = tpu.memref_squeeze %35 : memref<1x!tpu.dma_semaphore, #tpu.memory_space<semaphore_mem>> -> memref<!tpu.dma_semaphore, #tpu.memory_space<semaphore_mem>>
    tpu.enqueue_dma source(%32 : memref<32xf32, #tpu.memory_space<any>>) target(%34 : memref<32xf32, #tpu.memory_space<vmem>>) target_semaphore(%36 : memref<!tpu.dma_semaphore, #tpu.memory_space<semaphore_mem>>)
    %c4_i32 = arith.constant 4 : i32
    %37 = arith.addi %0, %c4_i32 : i32
    %38 = arith.index_cast %37 : i32 to index
    %39 = memref.load %arg1[%38] : memref<16xi32, #tpu.memory_space<smem>>
    %c4_i32_16 = arith.constant 4 : i32
    %c4_i32_17 = arith.constant 4 : i32
    %c0_i32_18 = arith.constant 0 : i32
    %40 = tpu.memref_slice %arg2[%39, %c0_i32_18] : memref<100x32xf32, #tpu.memory_space<any>> -> memref<1x32xf32, #tpu.memory_space<any>>
    %41 = tpu.memref_squeeze %40 : memref<1x32xf32, #tpu.memory_space<any>> -> memref<32xf32, #tpu.memory_space<any>>
    %c0_i32_19 = arith.constant 0 : i32
    %42 = tpu.memref_slice %arg3[%c4_i32_16, %c0_i32_19] : memref<16x32xf32, #tpu.memory_space<vmem>> -> memref<1x32xf32, #tpu.memory_space<vmem>>
    %43 = tpu.memref_squeeze %42 : memref<1x32xf32, #tpu.memory_space<vmem>> -> memref<32xf32, #tpu.memory_space<vmem>>
    %44 = tpu.memref_slice %arg4[%c4_i32_17] : memref<8x!tpu.dma_semaphore, #tpu.memory_space<semaphore_mem>> -> memref<1x!tpu.dma_semaphore, #tpu.memory_space<semaphore_mem>>
    %45 = tpu.memref_squeeze %44 : memref<1x!tpu.dma_semaphore, #tpu.memory_space<semaphore_mem>> -> memref<!tpu.dma_semaphore, #tpu.memory_space<semaphore_mem>>
    tpu.enqueue_dma source(%41 : memref<32xf32, #tpu.memory_space<any>>) target(%43 : memref<32xf32, #tpu.memory_space<vmem>>) target_semaphore(%45 : memref<!tpu.dma_semaphore, #tpu.memory_space<semaphore_mem>>)
    %c5_i32 = arith.constant 5 : i32
    %46 = arith.addi %0, %c5_i32 : i32
    %47 = arith.index_cast %46 : i32 to index
    %48 = memref.load %arg1[%47] : memref<16xi32, #tpu.memory_space<smem>>
    %c5_i32_20 = arith.constant 5 : i32
    %c5_i32_21 = arith.constant 5 : i32
    %c0_i32_22 = arith.constant 0 : i32
    %49 = tpu.memref_slice %arg2[%48, %c0_i32_22] : memref<100x32xf32, #tpu.memory_space<any>> -> memref<1x32xf32, #tpu.memory_space<any>>
    %50 = tpu.memref_squeeze %49 : memref<1x32xf32, #tpu.memory_space<any>> -> memref<32xf32, #tpu.memory_space<any>>
    %c0_i32_23 = arith.constant 0 : i32
    %51 = tpu.memref_slice %arg3[%c5_i32_20, %c0_i32_23] : memref<16x32xf32, #tpu.memory_space<vmem>> -> memref<1x32xf32, #tpu.memory_space<vmem>>
    %52 = tpu.memref_squeeze %51 : memref<1x32xf32, #tpu.memory_space<vmem>> -> memref<32xf32, #tpu.memory_space<vmem>>
    %53 = tpu.memref_slice %arg4[%c5_i32_21] : memref<8x!tpu.dma_semaphore, #tpu.memory_space<semaphore_mem>> -> memref<1x!tpu.dma_semaphore, #tpu.memory_space<semaphore_mem>>
    %54 = tpu.memref_squeeze %53 : memref<1x!tpu.dma_semaphore, #tpu.memory_space<semaphore_mem>> -> memref<!tpu.dma_semaphore, #tpu.memory_space<semaphore_mem>>
    tpu.enqueue_dma source(%50 : memref<32xf32, #tpu.memory_space<any>>) target(%52 : memref<32xf32, #tpu.memory_space<vmem>>) target_semaphore(%54 : memref<!tpu.dma_semaphore, #tpu.memory_space<semaphore_mem>>)
    %c6_i32 = arith.constant 6 : i32
    %55 = arith.addi %0, %c6_i32 : i32
    %56 = arith.index_cast %55 : i32 to index
    %57 = memref.load %arg1[%56] : memref<16xi32, #tpu.memory_space<smem>>
    %c6_i32_24 = arith.constant 6 : i32
    %c6_i32_25 = arith.constant 6 : i32
    %c0_i32_26 = arith.constant 0 : i32
    %58 = tpu.memref_slice %arg2[%57, %c0_i32_26] : memref<100x32xf32, #tpu.memory_space<any>> -> memref<1x32xf32, #tpu.memory_space<any>>
    %59 = tpu.memref_squeeze %58 : memref<1x32xf32, #tpu.memory_space<any>> -> memref<32xf32, #tpu.memory_space<any>>
    %c0_i32_27 = arith.constant 0 : i32
    %60 = tpu.memref_slice %arg3[%c6_i32_24, %c0_i32_27] : memref<16x32xf32, #tpu.memory_space<vmem>> -> memref<1x32xf32, #tpu.memory_space<vmem>>
    %61 = tpu.memref_squeeze %60 : memref<1x32xf32, #tpu.memory_space<vmem>> -> memref<32xf32, #tpu.memory_space<vmem>>
    %62 = tpu.memref_slice %arg4[%c6_i32_25] : memref<8x!tpu.dma_semaphore, #tpu.memory_space<semaphore_mem>> -> memref<1x!tpu.dma_semaphore, #tpu.memory_space<semaphore_mem>>
    %63 = tpu.memref_squeeze %62 : memref<1x!tpu.dma_semaphore, #tpu.memory_space<semaphore_mem>> -> memref<!tpu.dma_semaphore, #tpu.memory_space<semaphore_mem>>
    tpu.enqueue_dma source(%59 : memref<32xf32, #tpu.memory_space<any>>) target(%61 : memref<32xf32, #tpu.memory_space<vmem>>) target_semaphore(%63 : memref<!tpu.dma_semaphore, #tpu.memory_space<semaphore_mem>>)
    %c7_i32 = arith.constant 7 : i32
    %64 = arith.addi %0, %c7_i32 : i32
    %65 = arith.index_cast %64 : i32 to index
    %66 = memref.load %arg1[%65] : memref<16xi32, #tpu.memory_space<smem>>
    %c7_i32_28 = arith.constant 7 : i32
    %c7_i32_29 = arith.constant 7 : i32
    %c0_i32_30 = arith.constant 0 : i32
    %67 = tpu.memref_slice %arg2[%66, %c0_i32_30] : memref<100x32xf32, #tpu.memory_space<any>> -> memref<1x32xf32, #tpu.memory_space<any>>
    %68 = tpu.memref_squeeze %67 : memref<1x32xf32, #tpu.memory_space<any>> -> memref<32xf32, #tpu.memory_space<any>>
    %c0_i32_31 = arith.constant 0 : i32
    %69 = tpu.memref_slice %arg3[%c7_i32_28, %c0_i32_31] : memref<16x32xf32, #tpu.memory_space<vmem>> -> memref<1x32xf32, #tpu.memory_space<vmem>>
    %70 = tpu.memref_squeeze %69 : memref<1x32xf32, #tpu.memory_space<vmem>> -> memref<32xf32, #tpu.memory_space<vmem>>
    %71 = tpu.memref_slice %arg4[%c7_i32_29] : memref<8x!tpu.dma_semaphore, #tpu.memory_space<semaphore_mem>> -> memref<1x!tpu.dma_semaphore, #tpu.memory_space<semaphore_mem>>
    %72 = tpu.memref_squeeze %71 : memref<1x!tpu.dma_semaphore, #tpu.memory_space<semaphore_mem>> -> memref<!tpu.dma_semaphore, #tpu.memory_space<semaphore_mem>>
    tpu.enqueue_dma source(%68 : memref<32xf32, #tpu.memory_space<any>>) target(%70 : memref<32xf32, #tpu.memory_space<vmem>>) target_semaphore(%72 : memref<!tpu.dma_semaphore, #tpu.memory_space<semaphore_mem>>)
    %c0_i32_32 = arith.constant 0 : i32
    %c16_i32_33 = arith.constant 16 : i32
    %73 = arith.addi %c0_i32_32, %c16_i32_33 : i32
    %c1_i32_34 = arith.constant 1 : i32
    scf.for %arg5 = %c0_i32_32 to %73 step %c1_i32_34  : i32 {
      %c1_i32_36 = arith.constant 1 : i32
      %74 = arith.muli %arg5, %c1_i32_36 : i32
      %c0_i32_37 = arith.constant 0 : i32
      %75 = arith.addi %c0_i32_37, %74 : i32
      %c7_i32_38 = arith.constant 7 : i32
      %76 = arith.andi %75, %c7_i32_38 : i32
      %c0_i32_39 = arith.constant 0 : i32
      %c0_i32_40 = arith.constant 0 : i32
      %c0_i32_41 = arith.constant 0 : i32
      %77 = tpu.memref_slice %arg2[%c0_i32_39, %c0_i32_41] : memref<100x32xf32, #tpu.memory_space<any>> -> memref<1x32xf32, #tpu.memory_space<any>>
      %78 = tpu.memref_squeeze %77 : memref<1x32xf32, #tpu.memory_space<any>> -> memref<32xf32, #tpu.memory_space<any>>
      %c0_i32_42 = arith.constant 0 : i32
      %79 = tpu.memref_slice %arg3[%c0_i32_40, %c0_i32_42] : memref<16x32xf32, #tpu.memory_space<vmem>> -> memref<1x32xf32, #tpu.memory_space<vmem>>
      %80 = tpu.memref_squeeze %79 : memref<1x32xf32, #tpu.memory_space<vmem>> -> memref<32xf32, #tpu.memory_space<vmem>>
      %81 = tpu.memref_slice %arg4[%76] : memref<8x!tpu.dma_semaphore, #tpu.memory_space<semaphore_mem>> -> memref<1x!tpu.dma_semaphore, #tpu.memory_space<semaphore_mem>>
      %82 = tpu.memref_squeeze %81 : memref<1x!tpu.dma_semaphore, #tpu.memory_space<semaphore_mem>> -> memref<!tpu.dma_semaphore, #tpu.memory_space<semaphore_mem>>
      tpu.wait_dma2 semaphore(%82 : memref<!tpu.dma_semaphore, #tpu.memory_space<semaphore_mem>>) src(%78 : memref<32xf32, #tpu.memory_space<any>>) dst(%80 : memref<32xf32, #tpu.memory_space<vmem>>)
      %c8_i32 = arith.constant 8 : i32
      %83 = arith.addi %75, %c8_i32 : i32
      %c16_i32_43 = arith.constant 16 : i32
      %84 = arith.cmpi slt, %83, %c16_i32_43 : i32
      %85 = arith.extui %84 : i1 to i32
      %c0_i32_44 = arith.constant 0 : i32
      %86 = arith.cmpi ne, %85, %c0_i32_44 : i32
      scf.if %86 {
        %87 = arith.addi %0, %83 : i32
        %88 = arith.index_cast %87 : i32 to index
        %89 = memref.load %arg1[%88] : memref<16xi32, #tpu.memory_space<smem>>
        %c0_i32_45 = arith.constant 0 : i32
        %90 = tpu.memref_slice %arg2[%89, %c0_i32_45] : memref<100x32xf32, #tpu.memory_space<any>> -> memref<1x32xf32, #tpu.memory_space<any>>
        %91 = tpu.memref_squeeze %90 : memref<1x32xf32, #tpu.memory_space<any>> -> memref<32xf32, #tpu.memory_space<any>>
        %c0_i32_46 = arith.constant 0 : i32
        %92 = tpu.memref_slice %arg3[%83, %c0_i32_46] : memref<16x32xf32, #tpu.memory_space<vmem>> -> memref<1x32xf32, #tpu.memory_space<vmem>>
        %93 = tpu.memref_squeeze %92 : memref<1x32xf32, #tpu.memory_space<vmem>> -> memref<32xf32, #tpu.memory_space<vmem>>
        %94 = tpu.memref_slice %arg4[%76] : memref<8x!tpu.dma_semaphore, #tpu.memory_space<semaphore_mem>> -> memref<1x!tpu.dma_semaphore, #tpu.memory_space<semaphore_mem>>
        %95 = tpu.memref_squeeze %94 : memref<1x!tpu.dma_semaphore, #tpu.memory_space<semaphore_mem>> -> memref<!tpu.dma_semaphore, #tpu.memory_space<semaphore_mem>>
        tpu.enqueue_dma source(%91 : memref<32xf32, #tpu.memory_space<any>>) target(%93 : memref<32xf32, #tpu.memory_space<vmem>>) target_semaphore(%95 : memref<!tpu.dma_semaphore, #tpu.memory_space<semaphore_mem>>)
      } else {
      }
    }
    %c16_i32_35 = arith.constant 16 : i32
    return
  }
  func.func @transform_1(%arg0: i32, %arg1: memref<16xi32, #tpu.memory_space<smem>>) -> (i32, i32) {
    %c0_i32 = arith.constant 0 : i32
    %c0_i32_0 = arith.constant 0 : i32
    return %arg0, %c0_i32 : i32, i32
  }
}

</mosaic_0001>

<bundles_post_ra>
// kernel: word_embedding.1
= control target key start
LH: loop header
LB: loop body
LE: loop exit
PB: predicated region body
PF: predicated region fallthrough
CT: control target
= control target key end

     0   :  { %s799_s0 = inlined_call_operand.vmem [shape: s32[16], index: 0, kind: input, shape index: {}]   ;;  %s800_s1 = inlined_call_operand.vmem [shape: f32[100,32], index: 1, kind: input, shape index: {}]   ;;  %s801_s2 = inlined_call_operand.hbm [shape: f32[16,32], index: 2, kind: output, shape index: {}]  }
   0x1   :  { %s7_s11 = sshll.u32 %s799_s0, 4  ;;  %s8_s11 = int_to_ptr.vmem [resolvable:$true] %s7_s11 }
   0x2   :  { %s701_s12 = scalar_lea.vmem %s8_s11, 16  ;;  %p706_p1 = scmp.lt.s32.totalorder %s8_s11, %s8_s11 }
   0x3   :  { %p702_p0 = scmp.ne.s32.totalorder %s8_s11, %s701_s12  ;;  %p707_p2 = scmp.lt.s32.totalorder %s701_s12, %s701_s12 }
   0x5   :  { %p708_p3 = por %p707_p2, %p706_p1 }
   0x7   :  { %p709_p4 = pnand %p708_p3, %p702_p0 }
   0x9   :  { %712 = shalt.err (!%p709_p4)  }
   0xa   :  { %s747_s13 = smov [#allocation4]  }
   0xb   :  { %10 = dma.vmem_to_smem %s8_s11, 16, %s747_s13, [#allocation3] }
   0xc   :  { %737 = dma.done.wait [#allocation3], 16 }
   0xd   :  { %738 = vsyncadd [#allocation3], 4294967280 }
   0xe   :  { %12 = sfence }
   0xf   :  { %13 = vsyncpa [#allocation6], 0  ;;  %s15_s14 = sld [smem:[#allocation4]] }
  0x15   :  { %s16_s17 = scalar_lea.vmem %s800_s1, %s15_s14 }
  0x16   :  { %v35_v0 = vld [vmem:[%s16_s17] sm:$0x1] }
  0x17   :  { %36 = vst [vmem:[#allocation5] sm:$0x1] %v35_v0 }
  0x18   :  { %62 = vsyncadd [#allocation2], 16  ;;  %s671_s0 = sld [smem:[#allocation4 + $0x1]] }
  0x1e   :  { %s65_s20 = scalar_lea.vmem %s800_s1, %s671_s0 }
  0x1f   :  { %v86_v1 = vld [vmem:[%s65_s20] sm:$0x1] }
  0x20   :  { %87 = vst [vmem:[#allocation5 + $0x1] sm:$0x1] %v86_v1 }
  0x21   :  { %113 = vsyncadd [#allocation2 + $0x1], 16  ;;  %s672_s21 = sld [smem:[#allocation4 + $0x2]] }
  0x27   :  { %s116_s24 = scalar_lea.vmem %s800_s1, %s672_s21 }
  0x28   :  { %v137_v2 = vld [vmem:[%s116_s24] sm:$0x1] }
  0x29   :  { %138 = vst [vmem:[#allocation5 + $0x2] sm:$0x1] %v137_v2 }
  0x2a   :  { %164 = vsyncadd [#allocation2 + $0x2], 16  ;;  %s673_s25 = sld [smem:[#allocation4 + $0x3]] }
  0x30   :  { %s167_s28 = scalar_lea.vmem %s800_s1, %s673_s25 }
  0x31   :  { %v188_v3 = vld [vmem:[%s167_s28] sm:$0x1] }
  0x32   :  { %189 = vst [vmem:[#allocation5 + $0x3] sm:$0x1] %v188_v3 }
  0x33   :  { %215 = vsyncadd [#allocation2 + $0x3], 16  ;;  %s674_s29 = sld [smem:[#allocation4 + $0x4]] }
  0x39   :  { %s218_s4 = scalar_lea.vmem %s800_s1, %s674_s29 }
  0x3a   :  { %v239_v4 = vld [vmem:[%s218_s4] sm:$0x1] }
  0x3b   :  { %240 = vst [vmem:[#allocation5 + $0x4] sm:$0x1] %v239_v4 }
  0x3c   :  { %266 = vsyncadd [#allocation2 + $0x4], 16  ;;  %s675_s5 = sld [smem:[#allocation4 + $0x5]] }
  0x42   :  { %s269_s8 = scalar_lea.vmem %s800_s1, %s675_s5 }
  0x43   :  { %v290_v5 = vld [vmem:[%s269_s8] sm:$0x1] }
  0x44   :  { %291 = vst [vmem:[#allocation5 + $0x5] sm:$0x1] %v290_v5 }
  0x45   :  { %317 = vsyncadd [#allocation2 + $0x5], 16  ;;  %s676_s9 = sld [smem:[#allocation4 + $0x6]] }
  0x4b   :  { %s320_s12 = scalar_lea.vmem %s800_s1, %s676_s9 }
  0x4c   :  { %v341_v6 = vld [vmem:[%s320_s12] sm:$0x1] }
  0x4d   :  { %342 = vst [vmem:[#allocation5 + $0x6] sm:$0x1] %v341_v6 }
  0x4e   :  { %368 = vsyncadd [#allocation2 + $0x6], 16  ;;  %s677_s13 = sld [smem:[#allocation4 + $0x7]] }
  0x54   :  { %s371_s16 = scalar_lea.vmem %s800_s1, %s677_s13 }
  0x55   :  { %v392_v7 = vld [vmem:[%s371_s16] sm:$0x1] }
  0x56   :  { %393 = vst [vmem:[#allocation5 + $0x7] sm:$0x1] %v392_v7 }
  0x57   :  { %419 = vsyncadd [#allocation2 + $0x7], 16  ;;  %s743_s17 = smov 0  }
  0x58 LB: > { %s426_s0 = sand.u32 7, %s745_s17  ;;  %s745_s17 = sphi %s743_s17, %s425_s17  }
  0x59   : > { %s427_s18 = scalar_lea.sflag [#allocation2], %s426_s0 }
  0x5a   : > { %739 = dma.done.wait %s427_s18, 16 }
  0x5b   : > { %740 = vsyncadd %s427_s18, 4294967280  ;;  %s430_s19 = sadd.s32 8, %s745_s17 }
  0x5c   : > { %p678_p5 = scmp.ge.s32.totalorder %s430_s19, 16 }
  0x5d   : > { %s436_s20 = sld [smem:[#allocation4 + %s430_s19]] (!%p678_p5)  ;;  %s589_s24 = scalar_lea.vmem (!%p678_p5), [#allocation5], %s745_s17 }
  0x5e   : > { %434 = sbr.rel (%p678_p5) target bundleno = 103 (0x67), region = 252 }
  0x63   : > { %s437_s23 = scalar_lea.vmem %s800_s1, %s436_s20 }
  0x64   : > { %v457_v8 = vld [vmem:[%s437_s23] sm:$0x1] }
  0x65   : > { %680 = vst [vmem:[%s589_s24 + $0x8] sm:$0x1] %v457_v8 }
  0x66   : > { %484 = vsyncadd %s427_s18, 16 }
  0x67 PF: > { %s425_s17 = sadd.s32 1, %s745_s17  }
  0x68   : > { %p422_p6 = scmp.ge.s32.totalorder %s425_s17, 16  }
  0x69   :  { %s748_s25 = smov (%p422_p6), [#allocation5]  }
  0x6a   :  { %424 = sbr.rel (!%p422_p6) target bundleno = 88 (0x58), region = 423  ;;  %s490_s26 = sshll.u32 (%p422_p6), %s748_s25, 4  ;;  %s491_s26 = int_to_ptr.vmem [resolvable:$true] %s490_s26 }
  0x6b   :  { %s713_s27 = scalar_lea.vmem (%p422_p6), %s491_s26, 256  ;;  %p718_p8 = scmp.lt.s32.totalorder (%p422_p6), %s491_s26, %s491_s26 }
  0x6c   :  { %p714_p7 = scmp.ne.s32.totalorder (%p422_p6), %s491_s26, %s713_s27  ;;  %p719_p9 = scmp.lt.s32.totalorder (%p422_p6), %s713_s27, %s713_s27 }
  0x6e   :  { %p720_p10 = por (%p422_p6), %p719_p9, %p718_p8 }
  0x70   :  { %p721_p11 = pnand %p720_p10, %p714_p7 }
  0x72   :  { %724 = shalt.err (!%p721_p11)
}
  0x73   :  { %s749_s28 = smov 128   ;;  %s750_s29 = smov 8  }
  0x74   :  { %496 = dma.vmem_to_hbm [thread:$0]  %s491_s26, 256, %s801_s2, [#allocation6], %s749_s28, %s749_s28, %s750_s29  }
  0x75   :  { %741 = dma.done.wait [#allocation6], 256  }
  0x76   :  { %742 = vsyncadd [#allocation6], 4294967040 }
  0x77   :  { %500 = vsyncpa [#allocation6], 1 }
  0x78   :  { %501 = vsyncmov [#allocation2] }
  0x7b   :  { %s502_s1 = vpop.sfrf %501 }
  0x7c   :  { %p681_p12 = scmp.ne.s32.totalorder %s502_s1, 0 }
  0x7e   :  { %506 = shalt.err (%p681_p12)  }
  0x7f   :  { %508 = vsyncmov [#allocation2 + $0x1] }
  0x82   :  { %s509_s4 = vpop.sfrf %508 }
  0x83   :  { %p682_p13 = scmp.ne.s32.totalorder %s509_s4, 0 }
  0x85   :  { %513 = shalt.err (%p682_p13)  }
  0x86   :  { %515 = vsyncmov [#allocation2 + $0x2] }
  0x89   :  { %s516_s5 = vpop.sfrf %515 }
  0x8a   :  { %p683_p0 = scmp.ne.s32.totalorder %s516_s5, 0 }
  0x8c   :  { %520 = shalt.err (%p683_p0)  }
  0x8d   :  { %522 = vsyncmov [#allocation2 + $0x3] }
  0x90   :  { %s523_s6 = vpop.sfrf %522 }
  0x91   :  { %p684_p1 = scmp.ne.s32.totalorder %s523_s6, 0 }
  0x93   :  { %527 = shalt.err (%p684_p1)  }
  0x94   :  { %529 = vsyncmov [#allocation2 + $0x4] }
  0x97   :  { %s530_s2 = vpop.sfrf %529 }
  0x98   :  { %p685_p2 = scmp.ne.s32.totalorder %s530_s2, 0 }
  0x9a   :  { %534 = shalt.err (%p685_p2)  }
  0x9b   :  { %536 = vsyncmov [#allocation2 + $0x5] }
  0x9e   :  { %s537_s7 = vpop.sfrf %536 }
  0x9f   :  { %p686_p3 = scmp.ne.s32.totalorder %s537_s7, 0 }
  0xa1   :  { %541 = shalt.err (%p686_p3)  }
  0xa2   :  { %543 = vsyncmov [#allocation2 + $0x6] }
  0xa5   :  { %s544_s8 = vpop.sfrf %543 }
  0xa6   :  { %p687_p4 = scmp.ne.s32.totalorder %s544_s8, 0 }
  0xa8   :  { %548 = shalt.err (%p687_p4)  }
  0xa9   :  { %550 = vsyncmov [#allocation2 + $0x7] }
  0xac   :  { %s551_s9 = vpop.sfrf %550 }
  0xad   :  { %p688_p5 = scmp.ne.s32.totalorder %s551_s9, 0 }
  0xaf   :  { %555 = shalt.err (%p688_p5)  }

</bundles_post_ra>
